<compile_context>
chip_gen: v5e
topology: v5e:2x2
jax: 0.10.0
libtpu: 0.0.40
codegen_flags: <defaults>
</compile_context>

<pallas_src>
import functools

import jax
import jax.numpy as jnp
from jax.experimental import pallas as pl
from jax.experimental.pallas import tpu as pltpu


def _weight_norm(v, g):
    """PyTorch weight_norm (dim=0): w[o] = g[o] * v[o] / ||v[o]||_F."""
    norm = jnp.sqrt(jnp.sum(v * v, axis=tuple(range(1, v.ndim)), keepdims=True))
    return (g.reshape((-1,) + (1,) * (v.ndim - 1)) / norm) * v


def _temporal_block_kernel(*refs, k, d, p, has_downsample):
    if has_downsample:
        (xp_ref, w1_ref, b1_ref, w2_ref, b2_ref, wd_ref, bd_ref,
         o_ref, hpad_ref) = refs
    else:
        (xp_ref, w1_ref, b1_ref, w2_ref, b2_ref,
         o_ref, hpad_ref) = refs

    c_out, l = o_ref.shape[1], o_ref.shape[2]

    # Causally pre-padded input plane for this batch element: (C_in, L + P).
    xp = xp_ref[0].astype(jnp.float32)

    # --- conv1 (dilated, causal == conv + chomp fused) + bias + ReLU --------
    acc1 = jnp.zeros((c_out, l), jnp.float32)
    for i in range(k):
        acc1 = acc1 + jnp.dot(w1_ref[i].astype(jnp.float32),
                              xp[:, d * i:d * i + l],
                              preferred_element_type=jnp.float32)
    h = jnp.maximum(acc1 + b1_ref[...].astype(jnp.float32), 0.0)
    # TODO(synk): dropout1 / dropout2 are inference-mode identities here.

    # --- conv2 (dilated, causal) + bias + ReLU -------------------------------
    # Scratch layout: [:, :p] causal zeros, [:, p:] = h.  Only the prefix needs
    # an explicit fill; the rest is fully overwritten.
    if p > 0:
        hpad_ref[:, :p] = jnp.zeros((c_out, p), jnp.float32)
    hpad_ref[:, p:] = h
    hp = hpad_ref[...]
    acc2 = jnp.zeros((c_out, l), jnp.float32)
    for i in range(k):
        acc2 = acc2 + jnp.dot(w2_ref[i].astype(jnp.float32),
                              hp[:, d * i:d * i + l],
                              preferred_element_type=jnp.float32)
    out = jnp.maximum(acc2 + b2_ref[...].astype(jnp.float32), 0.0)

    # --- residual (optional 1x1 conv) + final ReLU ---------------------------
    x_res = xp[:, p:]                                     # original unpadded x
    if has_downsample:
        res = (jnp.dot(wd_ref[...].astype(jnp.float32), x_res,
                       preferred_element_type=jnp.float32)
               + bd_ref[...].astype(jnp.float32))
    else:
        res = x_res
    o_ref[...] = jnp.maximum(out + res, 0.0)[None].astype(o_ref.dtype)


def temporal_block(x, params, *, kernel_size, stride, dilation, padding):
    """Inference forward of TemporalBlock for x of shape (N, C_in, L)."""
    n, c_in, l = x.shape
    k, d, p = kernel_size, dilation, padding
    assert stride == 1, "TCN TemporalBlock uses stride=1"
    assert p == d * (k - 1), (
        "residual add requires padding == dilation*(kernel_size-1)")

    w1 = _weight_norm(params["conv1_v"], params["conv1_g"])   # (C_out, C_in, K)
    w2 = _weight_norm(params["conv2_v"], params["conv2_g"])   # (C_out, C_out, K)
    c_out = w1.shape[0]
    has_ds = c_in != c_out

    # Causal left-pad once on the host; the chomped tail is never materialized.
    xpad = jnp.pad(x, ((0, 0), (0, 0), (p, 0))) if p > 0 else x

    # Taps as the leading dim so the kernel indexes whole (C_out, C) matrices.
    w1_k = jnp.transpose(w1, (2, 0, 1))
    w2_k = jnp.transpose(w2, (2, 0, 1))
    b1 = params["conv1_b"].reshape(c_out, 1)
    b2 = params["conv2_b"].reshape(c_out, 1)

    args = [xpad, w1_k, b1, w2_k, b2]
    in_specs = [
        pl.BlockSpec((1, c_in, l + p), lambda i: (i, 0, 0)),
        pl.BlockSpec((k, c_out, c_in), lambda i: (0, 0, 0)),
        pl.BlockSpec((c_out, 1), lambda i: (0, 0)),
        pl.BlockSpec((k, c_out, c_out), lambda i: (0, 0, 0)),
        pl.BlockSpec((c_out, 1), lambda i: (0, 0)),
    ]
    if has_ds:
        args += [params["down_w"], params["down_b"].reshape(c_out, 1)]
        in_specs += [
            pl.BlockSpec((c_out, c_in), lambda i: (0, 0)),
            pl.BlockSpec((c_out, 1), lambda i: (0, 0)),
        ]

    kernel = functools.partial(_temporal_block_kernel, k=k, d=d, p=p,
                               has_downsample=has_ds)

    return pl.pallas_call(
        kernel,
        out_shape=jax.ShapeDtypeStruct((n, c_out, l), x.dtype),
        grid_spec=pltpu.PrefetchScalarGridSpec(
            num_scalar_prefetch=0,
            grid=(n,),
            in_specs=in_specs,
            out_specs=pl.BlockSpec((1, c_out, l), lambda i: (i, 0, 0)),
            scratch_shapes=[
                pltpu.VMEM((c_out, l + p), jnp.float32),   # causally padded h
            ],
        ),
        compiler_params=pltpu.CompilerParams(
            dimension_semantics=("parallel",),
        ),
    )(*args)


def _reference_forward(x, params, *, kernel_size, dilation, padding):
    """Pure-JAX reference matching the PyTorch TemporalBlock (eval mode)."""
    k, d, p = kernel_size, dilation, padding
    w1 = _weight_norm(params["conv1_v"], params["conv1_g"])
    w2 = _weight_norm(params["conv2_v"], params["conv2_g"])
    c_in, c_out = x.shape[1], w1.shape[0]

    def conv(inp, w, b):
        y = jax.lax.conv_general_dilated(
            inp, w, window_strides=(1,), padding=[(p, p)],
            rhs_dilation=(d,), dimension_numbers=("NCH", "OIH", "NCH"),
            precision=jax.lax.Precision.HIGHEST)
        return y + b[None, :, None]

    def chomp(y):
        return y[:, :, :-p] if p > 0 else y

    h = jax.nn.relu(chomp(conv(x, w1, params["conv1_b"])))
    out = jax.nn.relu(chomp(conv(h, w2, params["conv2_b"])))
    if c_in != c_out:
        res = (jnp.einsum("oc,ncl->nol", params["down_w"], x,
                          precision=jax.lax.Precision.HIGHEST)
               + params["down_b"][None, :, None])
    else:
        res = x
    return jax.nn.relu(out + res)


if __name__ == "__main__":
    key = jax.random.PRNGKey(0)
    N, C_IN, C_OUT, L = 2, 4, 8, 16
    K, STRIDE, DIL = 3, 1, 1
    PAD = DIL * (K - 1)      # standard TCN causal padding (chomped on the right)

    kx, k1v, k1g, k1b, k2v, k2g, k2b, kdw, kdb = jax.random.split(key, 9)
    params = {
        "conv1_v": 0.01 * jax.random.normal(k1v, (C_OUT, C_IN, K), jnp.float32),
        "conv1_g": 1.0 + 0.1 * jax.random.normal(k1g, (C_OUT,), jnp.float32),
        "conv1_b": 0.1 * jax.random.normal(k1b, (C_OUT,), jnp.float32),
        "conv2_v": 0.01 * jax.random.normal(k2v, (C_OUT, C_OUT, K), jnp.float32),
        "conv2_g": 1.0 + 0.1 * jax.random.normal(k2g, (C_OUT,), jnp.float32),
        "conv2_b": 0.1 * jax.random.normal(k2b, (C_OUT,), jnp.float32),
        "down_w": 0.01 * jax.random.normal(kdw, (C_OUT, C_IN), jnp.float32),
        "down_b": 0.1 * jax.random.normal(kdb, (C_OUT,), jnp.float32),
    }
    x = jax.random.normal(kx, (N, C_IN, L), jnp.float32)

    out = temporal_block(x, params, kernel_size=K, stride=STRIDE,
                         dilation=DIL, padding=PAD)
    out = jax.block_until_ready(out)

    ref = _reference_forward(x, params, kernel_size=K, dilation=DIL, padding=PAD)
    assert out.shape == (N, C_OUT, L), out.shape
    assert jnp.allclose(out, ref, atol=1e-4, rtol=1e-4), (
        "max abs err = %g" % float(jnp.max(jnp.abs(out - ref))))

    print("KERNEL_OK")
</pallas_src>

<mosaic_0001>
module attributes {stable_mosaic.version = 11 : i64} {
  func.func @_temporal_block_kernel(%arg0: i32, %arg1: memref<1x4x18xf32, #tpu.memory_space<vmem>>, %arg2: memref<3x8x4xf32, #tpu.memory_space<vmem>>, %arg3: memref<8x1xf32, #tpu.memory_space<vmem>>, %arg4: memref<3x8x8xf32, #tpu.memory_space<vmem>>, %arg5: memref<8x1xf32, #tpu.memory_space<vmem>>, %arg6: memref<8x4xf32, #tpu.memory_space<vmem>>, %arg7: memref<8x1xf32, #tpu.memory_space<vmem>>, %arg8: memref<1x8x16xf32, #tpu.memory_space<vmem>>, %arg9: memref<8x18xf32, #tpu.memory_space<vmem>>) attributes {dimension_semantics = [#tpu.dimension_semantics<parallel>], iteration_bounds = array<i64: 2>, scalar_prefetch = 0 : i64, scratch_operands = 1 : i64, tpu.core_type = #tpu.core_type<tc>, window_params = [{transform_indices = @transform_0, window_bounds = array<i64: 1, 4, 18>}, {pipeline_mode = #tpu.pipeline_mode<synchronous>, transform_indices = @transform_1, window_bounds = array<i64: 3, 8, 4>}, {pipeline_mode = #tpu.pipeline_mode<synchronous>, transform_indices = @transform_2, window_bounds = array<i64: 8, 1>}, {pipeline_mode = #tpu.pipeline_mode<synchronous>, transform_indices = @transform_3, window_bounds = array<i64: 3, 8, 8>}, {pipeline_mode = #tpu.pipeline_mode<synchronous>, transform_indices = @transform_4, window_bounds = array<i64: 8, 1>}, {pipeline_mode = #tpu.pipeline_mode<synchronous>, transform_indices = @transform_5, window_bounds = array<i64: 8, 4>}, {pipeline_mode = #tpu.pipeline_mode<synchronous>, transform_indices = @transform_6, window_bounds = array<i64: 8, 1>}, {transform_indices = @transform_7, window_bounds = array<i64: 1, 8, 16>}]} {
    %c0 = arith.constant 0 : index
    %c0_0 = arith.constant 0 : index
    %c0_1 = arith.constant 0 : index
    %0 = vector.load %arg1[%c0, %c0_0, %c0_1] : memref<1x4x18xf32, #tpu.memory_space<vmem>>, vector<1x4x18xf32>
    %1 = vector.shape_cast %0 : vector<1x4x18xf32> to vector<4x18xf32>
    %cst = arith.constant 0.000000e+00 : f32
    %2 = vector.broadcast %cst : f32 to vector<8x16xf32>
    %c0_2 = arith.constant 0 : index
    %c0_3 = arith.constant 0 : index
    %c0_4 = arith.constant 0 : index
    %3 = vector.load %arg2[%c0_2, %c0_3, %c0_4] : memref<3x8x4xf32, #tpu.memory_space<vmem>>, vector<1x8x4xf32>
    %4 = vector.shape_cast %3 : vector<1x8x4xf32> to vector<8x4xf32>
    %5 = vector.extract_strided_slice %1 {offsets = [0, 0], sizes = [4, 16], strides = [1, 1]} : vector<4x18xf32> to vector<4x16xf32>
    %cst_5 = arith.constant dense<0.000000e+00> : vector<8x16xf32>
    %6 = tpu.matmul %4, %5, %cst_5 {dimension_numbers = #tpu.dot_dimension_numbers<[1], [0], [0], [1], [0, 0, 1, 1], [], []>} : vector<8x4xf32>, vector<4x16xf32>, vector<8x16xf32> -> vector<8x16xf32>
    %7 = arith.addf %2, %6 : vector<8x16xf32>
    %c1 = arith.constant 1 : index
    %c0_6 = arith.constant 0 : index
    %c0_7 = arith.constant 0 : index
    %8 = vector.load %arg2[%c1, %c0_6, %c0_7] : memref<3x8x4xf32, #tpu.memory_space<vmem>>, vector<1x8x4xf32>
    %9 = vector.shape_cast %8 : vector<1x8x4xf32> to vector<8x4xf32>
    %10 = vector.extract_strided_slice %1 {offsets = [0, 1], sizes = [4, 16], strides = [1, 1]} : vector<4x18xf32> to vector<4x16xf32>
    %cst_8 = arith.constant dense<0.000000e+00> : vector<8x16xf32>
    %11 = tpu.matmul %9, %10, %cst_8 {dimension_numbers = #tpu.dot_dimension_numbers<[1], [0], [0], [1], [0, 0, 1, 1], [], []>} : vector<8x4xf32>, vector<4x16xf32>, vector<8x16xf32> -> vector<8x16xf32>
    %12 = arith.addf %7, %11 : vector<8x16xf32>
    %c2 = arith.constant 2 : index
    %c0_9 = arith.constant 0 : index
    %c0_10 = arith.constant 0 : index
    %13 = vector.load %arg2[%c2, %c0_9, %c0_10] : memref<3x8x4xf32, #tpu.memory_space<vmem>>, vector<1x8x4xf32>
    %14 = vector.shape_cast %13 : vector<1x8x4xf32> to vector<8x4xf32>
    %15 = vector.extract_strided_slice %1 {offsets = [0, 2], sizes = [4, 16], strides = [1, 1]} : vector<4x18xf32> to vector<4x16xf32>
    %cst_11 = arith.constant dense<0.000000e+00> : vector<8x16xf32>
    %16 = tpu.matmul %14, %15, %cst_11 {dimension_numbers = #tpu.dot_dimension_numbers<[1], [0], [0], [1], [0, 0, 1, 1], [], []>} : vector<8x4xf32>, vector<4x16xf32>, vector<8x16xf32> -> vector<8x16xf32>
    %17 = arith.addf %12, %16 : vector<8x16xf32>
    %c0_12 = arith.constant 0 : index
    %c0_13 = arith.constant 0 : index
    %18 = vector.load %arg3[%c0_12, %c0_13] : memref<8x1xf32, #tpu.memory_space<vmem>>, vector<8x1xf32>
    %19 = vector.broadcast %18 : vector<8x1xf32> to vector<8x16xf32>
    %20 = arith.addf %17, %19 : vector<8x16xf32>
    %cst_14 = arith.constant 0.000000e+00 : f32
    %21 = vector.broadcast %cst_14 : f32 to vector<8x16xf32>
    %22 = arith.maximumf %20, %21 : vector<8x16xf32>
    %cst_15 = arith.constant 0.000000e+00 : f32
    %23 = vector.broadcast %cst_15 : f32 to vector<8x2xf32>
    %c0_16 = arith.constant 0 : index
    %c0_17 = arith.constant 0 : index
    %24 = vector.load %arg9[%c0_16, %c0_17] : memref<8x18xf32, #tpu.memory_space<vmem>>, vector<8x2xf32>
    tpu.vector_store %arg9[%c0_16, %c0_17], %23 {strides = array<i32>} : memref<8x18xf32, #tpu.memory_space<vmem>>, vector<8x2xf32>,
    %c0_18 = arith.constant 0 : index
    %c2_19 = arith.constant 2 : index
    %25 = vector.load %arg9[%c0_18, %c2_19] : memref<8x18xf32, #tpu.memory_space<vmem>>, vector<8x16xf32>
    tpu.vector_store %arg9[%c0_18, %c2_19], %22 {strides = array<i32>} : memref<8x18xf32, #tpu.memory_space<vmem>>, vector<8x16xf32>,
    %c0_20 = arith.constant 0 : index
    %c0_21 = arith.constant 0 : index
    %26 = vector.load %arg9[%c0_20, %c0_21] : memref<8x18xf32, #tpu.memory_space<vmem>>, vector<8x18xf32>
    %cst_22 = arith.constant 0.000000e+00 : f32
    %27 = vector.broadcast %cst_22 : f32 to vector<8x16xf32>
    %c0_23 = arith.constant 0 : index
    %c0_24 = arith.constant 0 : index
    %c0_25 = arith.constant 0 : index
    %28 = vector.load %arg4[%c0_23, %c0_24, %c0_25] : memref<3x8x8xf32, #tpu.memory_space<vmem>>, vector<1x8x8xf32>
    %29 = vector.shape_cast %28 : vector<1x8x8xf32> to vector<8x8xf32>
    %30 = vector.extract_strided_slice %26 {offsets = [0, 0], sizes = [8, 16], strides = [1, 1]} : vector<8x18xf32> to vector<8x16xf32>
    %cst_26 = arith.constant dense<0.000000e+00> : vector<8x16xf32>
    %31 = tpu.matmul %29, %30, %cst_26 {dimension_numbers = #tpu.dot_dimension_numbers<[1], [0], [0], [1], [0, 0, 1, 1], [], []>} : vector<8x8xf32>, vector<8x16xf32>, vector<8x16xf32> -> vector<8x16xf32>
    %32 = arith.addf %27, %31 : vector<8x16xf32>
    %c1_27 = arith.constant 1 : index
    %c0_28 = arith.constant 0 : index
    %c0_29 = arith.constant 0 : index
    %33 = vector.load %arg4[%c1_27, %c0_28, %c0_29] : memref<3x8x8xf32, #tpu.memory_space<vmem>>, vector<1x8x8xf32>
    %34 = vector.shape_cast %33 : vector<1x8x8xf32> to vector<8x8xf32>
    %35 = vector.extract_strided_slice %26 {offsets = [0, 1], sizes = [8, 16], strides = [1, 1]} : vector<8x18xf32> to vector<8x16xf32>
    %cst_30 = arith.constant dense<0.000000e+00> : vector<8x16xf32>
    %36 = tpu.matmul %34, %35, %cst_30 {dimension_numbers = #tpu.dot_dimension_numbers<[1], [0], [0], [1], [0, 0, 1, 1], [], []>} : vector<8x8xf32>, vector<8x16xf32>, vector<8x16xf32> -> vector<8x16xf32>
    %37 = arith.addf %32, %36 : vector<8x16xf32>
    %c2_31 = arith.constant 2 : index
    %c0_32 = arith.constant 0 : index
    %c0_33 = arith.constant 0 : index
    %38 = vector.load %arg4[%c2_31, %c0_32, %c0_33] : memref<3x8x8xf32, #tpu.memory_space<vmem>>, vector<1x8x8xf32>
    %39 = vector.shape_cast %38 : vector<1x8x8xf32> to vector<8x8xf32>
    %40 = vector.extract_strided_slice %26 {offsets = [0, 2], sizes = [8, 16], strides = [1, 1]} : vector<8x18xf32> to vector<8x16xf32>
    %cst_34 = arith.constant dense<0.000000e+00> : vector<8x16xf32>
    %41 = tpu.matmul %39, %40, %cst_34 {dimension_numbers = #tpu.dot_dimension_numbers<[1], [0], [0], [1], [0, 0, 1, 1], [], []>} : vector<8x8xf32>, vector<8x16xf32>, vector<8x16xf32> -> vector<8x16xf32>
    %42 = arith.addf %37, %41 : vector<8x16xf32>
    %c0_35 = arith.constant 0 : index
    %c0_36 = arith.constant 0 : index
    %43 = vector.load %arg5[%c0_35, %c0_36] : memref<8x1xf32, #tpu.memory_space<vmem>>, vector<8x1xf32>
    %44 = vector.broadcast %43 : vector<8x1xf32> to vector<8x16xf32>
    %45 = arith.addf %42, %44 : vector<8x16xf32>
    %cst_37 = arith.constant 0.000000e+00 : f32
    %46 = vector.broadcast %cst_37 : f32 to vector<8x16xf32>
    %47 = arith.maximumf %45, %46 : vector<8x16xf32>
    %48 = vector.extract_strided_slice %1 {offsets = [0, 2], sizes = [4, 16], strides = [1, 1]} : vector<4x18xf32> to vector<4x16xf32>
    %c0_38 = arith.constant 0 : index
    %c0_39 = arith.constant 0 : index
    %49 = vector.load %arg6[%c0_38, %c0_39] : memref<8x4xf32, #tpu.memory_space<vmem>>, vector<8x4xf32>
    %cst_40 = arith.constant dense<0.000000e+00> : vector<8x16xf32>
    %50 = tpu.matmul %49, %48, %cst_40 {dimension_numbers = #tpu.dot_dimension_numbers<[1], [0], [0], [1], [0, 0, 1, 1], [], []>} : vector<8x4xf32>, vector<4x16xf32>, vector<8x16xf32> -> vector<8x16xf32>
    %c0_41 = arith.constant 0 : index
    %c0_42 = arith.constant 0 : index
    %51 = vector.load %arg7[%c0_41, %c0_42] : memref<8x1xf32, #tpu.memory_space<vmem>>, vector<8x1xf32>
    %52 = vector.broadcast %51 : vector<8x1xf32> to vector<8x16xf32>
    %53 = arith.addf %50, %52 : vector<8x16xf32>
    %54 = arith.addf %47, %53 : vector<8x16xf32>
    %cst_43 = arith.constant 0.000000e+00 : f32
    %55 = vector.broadcast %cst_43 : f32 to vector<8x16xf32>
    %56 = arith.maximumf %54, %55 : vector<8x16xf32>
    %57 = vector.shape_cast %56 : vector<8x16xf32> to vector<1x8x16xf32>
    %c0_44 = arith.constant 0 : index
    %c0_45 = arith.constant 0 : index
    %c0_46 = arith.constant 0 : index
    %58 = vector.load %arg8[%c0_44, %c0_45, %c0_46] : memref<1x8x16xf32, #tpu.memory_space<vmem>>, vector<1x8x16xf32>
    tpu.vector_store %arg8[%c0_44, %c0_45, %c0_46], %57 {strides = array<i32>} : memref<1x8x16xf32, #tpu.memory_space<vmem>>, vector<1x8x16xf32>,
    return
  }
  func.func @transform_0(%arg0: i32) -> (i32, i32, i32) {
    %c0_i32 = arith.constant 0 : i32
    %c0_i32_0 = arith.constant 0 : i32
    %c0_i32_1 = arith.constant 0 : i32
    return %arg0, %c0_i32, %c0_i32_0 : i32, i32, i32
  }
  func.func @transform_1(%arg0: i32) -> (i32, i32, i32) {
    %c0_i32 = arith.constant 0 : i32
    %c0_i32_0 = arith.constant 0 : i32
    %c0_i32_1 = arith.constant 0 : i32
    %c0_i32_2 = arith.constant 0 : i32
    return %c0_i32, %c0_i32_0, %c0_i32_1 : i32, i32, i32
  }
  func.func @transform_2(%arg0: i32) -> (i32, i32) {
    %c0_i32 = arith.constant 0 : i32
    %c0_i32_0 = arith.constant 0 : i32
    %c0_i32_1 = arith.constant 0 : i32
    return %c0_i32, %c0_i32_0 : i32, i32
  }
  func.func @transform_3(%arg0: i32) -> (i32, i32, i32) {
    %c0_i32 = arith.constant 0 : i32
    %c0_i32_0 = arith.constant 0 : i32
    %c0_i32_1 = arith.constant 0 : i32
    %c0_i32_2 = arith.constant 0 : i32
    return %c0_i32, %c0_i32_0, %c0_i32_1 : i32, i32, i32
  }
  func.func @transform_4(%arg0: i32) -> (i32, i32) {
    %c0_i32 = arith.constant 0 : i32
    %c0_i32_0 = arith.constant 0 : i32
    %c0_i32_1 = arith.constant 0 : i32
    return %c0_i32, %c0_i32_0 : i32, i32
  }
  func.func @transform_5(%arg0: i32) -> (i32, i32) {
    %c0_i32 = arith.constant 0 : i32
    %c0_i32_0 = arith.constant 0 : i32
    %c0_i32_1 = arith.constant 0 : i32
    return %c0_i32, %c0_i32_0 : i32, i32
  }
  func.func @transform_6(%arg0: i32) -> (i32, i32) {
    %c0_i32 = arith.constant 0 : i32
    %c0_i32_0 = arith.constant 0 : i32
    %c0_i32_1 = arith.constant 0 : i32
    return %c0_i32, %c0_i32_0 : i32, i32
  }
  func.func @transform_7(%arg0: i32) -> (i32, i32, i32) {
    %c0_i32 = arith.constant 0 : i32
    %c0_i32_0 = arith.constant 0 : i32
    %c0_i32_1 = arith.constant 0 : i32
    return %arg0, %c0_i32, %c0_i32_0 : i32, i32, i32
  }
}

</mosaic_0001>

<bundles_post_ra>
// kernel: tpu_custom_call.1
= control target key start
LH: loop header
LB: loop body
LE: loop exit
PB: predicated region body
PF: predicated region fallthrough
CT: control target
= control target key end

     0   :  { %12 = vsyncpa [#allocation4], 0  ;;  %s887_s0 = inlined_call_operand.vmem [shape: f32[2,4,18], index: 0, kind: input, shape index: {}]   ;;  %s888_s1 = inlined_call_operand.vmem [shape: f32[3,8,4], index: 1, kind: input, shape index: {}]   ;;  %s889_s2 = inlined_call_operand.vmem [shape: f32[8,1], index: 2, kind: input, shape index: {}]   ;;  %s890_s3 = inlined_call_operand.vmem [shape: f32[3,8,8], index: 3, kind: input, shape index: {}]   ;;  %s891_s4 = inlined_call_operand.vmem [shape: f32[8,1], index: 4, kind: input, shape index: {}]   ;;  %s892_s5 = inlined_call_operand.vmem [shape: f32[8,4], index: 5, kind: input, shape index: {}]   ;;  %s893_s6 = inlined_call_operand.vmem [shape: f32[8,1], index: 6, kind: input, shape index: {}]   ;;  %s894_s7 = inlined_call_operand.hbm [shape: f32[2,8,16], index: 7, kind: output, shape index: {}]  }
   0x1   :  { %14 = vsyncpa [#allocation4 + $0x1], 0  ;;  %s760_s24 = smov 0   ;;  %s762_s25 = smov 0  }
   0x2   :  { %s764_s26 = smov 0   ;;  %s766_s27 = smov 0  }
   0x3 LB: > { %s781_s28 = sadd.s32 4294967295, %s713_s27   ;;  %s580_s29 = sadd.s32 4294967294, %s713_s27   ;;  %s713_s27 = sphi %s766_s27, %s900_s27   ;;  %s709_s26 = sphi %s764_s26, %s899_s26   ;;  %s705_s25 = sphi %s762_s25, %s898_s25   ;;  %s701_s24 = sphi %s760_s24, %s897_s24  }
   0x4   : > { %s785_s30 = sadd.s32 1, %s713_s27   ;;  %s179_s8 = sadd.s32 1, %s709_s26 }
   0x5   : > { %s176_s9 = ssub.s32 %s713_s27, %s785_s30  ;;  %p189_p0 = scmp.ne.s32.totalorder %s709_s26, %s705_s25 }
   0x6   : > { %p177_p1 = scmp.eq.s32.totalorder %s176_s9, 0  ;;  %p190_p2 = scmp.eq.s32.totalorder %s781_s28, 1 }
   0x7   : > { %p195_p3 = scmp.ne.s32.totalorder %s705_s25, %s701_s24  ;;  %p196_p4 = scmp.eq.s32.totalorder %s580_s29, 1 }
   0x8   : > { %s796_s10 = scalar_select %p177_p1, %s709_s26, %s179_s8  }
   0x9   : > { %p798_p5 = por %p190_p2, %p189_p0  ;;  %p802_p6 = por %p196_p4, %p195_p3 }
   0xa   : > { %p583_p7 = scmp.ge.s32.totalorder %s713_s27, 1  ;;  %p239_p8 = scmp.lt.s32.totalorder %s713_s27, 3 }
   0xc   : > { %p240_p9 = pnand %p583_p7, %p239_p8 }
   0xd   : > { %p270_p10 = scmp.lt.s32.totalorder (!%p240_p9), %s781_s28, 1  ;;  %s715_s18 = smov (!%p240_p9), 126  }
   0xe   : > { %243 = sbr.rel (%p240_p9) target bundleno = 644 (0x284), region = 48  ;;  %s716_s19 = smov (!%p240_p9), 127  }
   0xf   : > { %s719_s16 = smov (!%p240_p9), 2   ;;  %s602_s15 = sshll.u32 (!%p240_p9), %s781_s28, 3 }
  0x10   : > { %s516_s20 = scalar_lea.hbm (!%p240_p9), %s894_s7, %s602_s15 }
  0x11   : > { %s520_s23 = sshll.u32 (!%p240_p9), %s516_s20, 4  ;;  %s521_s23 = int_to_ptr.hbm [resolvable:$true] %s520_s23 }
  0x12   : > { %s665_s29 = sshra.s32 (!%p240_p9), %s521_s23, 4  ;;  %s666_s29 = int_to_ptr.hbm [resolvable:$true] %s665_s29 }
  0x13   : > { %s271_s13 = scalar_select %p270_p10, %s781_s28, 1  ;;  %vm285_vm0 = vcmask 1043456   ;;  %vm281_vm1 = vcmask 31744   ;;  %v275_v1 = vld [vmem:[%s888_s1] sm:$0xff]  ;;  %v717_v3 = vmov 0   ;;  %v591_v5 = vld [vmem:[%s888_s1 + $0x10] sm:$0xff] }
  0x14   : > { %v363_v2 = vld [vmem:[%s889_s2] sm:$0xff]  ;;  %649 = vset.pattern.permute.xlu1 %v717_v3  ;;  %650 = vset.pattern.permute.xlu0 %v717_v3  ;;  %v586_v6 = vld [vmem:[%s888_s1 + $0x8] sm:$0xff]  ;;  %vm371_vm2 = vcmask 15360   ;;  %v718_v9 = vmov 0.0   ;;  %vm377_vm3 = vcmask 146448   ;;  %vm387_vm4 = vcmask 64512   ;;  %p672_p0 = scmp.lt.s32.totalorder %s666_s29, %s894_s7 }
  0x15   : > { %s585_s14 = sshll.u32 %s271_s13, 2  ;;  %366 = vperm.xlu1 %649, %v363_v2   ;;  %v471_v8 = vld [vmem:[%s892_s5] sm:$0xff]  ;;  %372 = vst.msk [vmem:[#allocation2] sm:$0xff] %vm371_vm2, %v718_v9  ;;  %v594_v23 = vld [vmem:[%s890_s3 + $0x8] sm:$0xff]  ;;  %v597_v25 = vld [vmem:[%s890_s3 + $0x10] sm:$0xff]  ;;  %s267_s13 = sand.u32 1, %s705_s25  }
  0x16   : > { %s273_s17 = scalar_lea.vmem %s887_s0, %s585_s14  ;;  %v472_v18 = vld [vmem:[%s893_s6] sm:$0xff]  ;;  %s584_s14 = sshll.u32 %s267_s13, 3  ;;  %vm503_vm5 = vcmask 130048  }
  0x17   : > { %v274_v0 = vld [vmem:[%s273_s17] sm:$0xf]  ;;  %s269_s21 = scalar_lea.vmem [#allocation3], %s584_s14  ;;  %s506_s28 = scalar_lea.sflag [#allocation4], %s267_s13 }
  0x18   : > { %335 = vrot.lane.b32.xlu0 %v274_v0, %s715_s18  ;;  %589 = vmatpush.msk.msra.mxu1 %vm285_vm0, %v274_v0  ;;  %v380_v21 = vld [vmem:[%s890_s3] sm:$0xff]  ;;  %s518_s22 = sshll.u32 %s269_s21, 4  ;;  %s667_s8 = scalar_lea.hbm %s666_s29, 8  ;;  %s519_s22 = int_to_ptr.vmem [resolvable:$true] %s518_s22 }
  0x19   : > { %590 = vmatmul.msk.f32.vlgmr.msra.gmra.mxu1 %vm281_vm1, %v275_v1  ;;  %v463_v22 = vld [vmem:[%s891_s4] sm:$0xff]  ;;  %p668_p11 = scmp.ne.s32.totalorder %s666_s29, %s667_s8 }
  0x1b   : > { %p669_p12 = pnand %p668_p11, %p798_p5 }
  0x1d   : > { %p670_p13 = pneg %p669_p12 }
  0x20   : > { %279 = vrot.lane.b32.xlu0 %v274_v0, %s716_s19 }
  0x28   : > { %466 = vperm.xlu0 %650, %v463_v22  }
  0x87   : > { %v367_v14 = vpop.permute.xlu1 %366 }
  0x8a   : > { %v336_v4 = vpop.permute.xlu0 %335 }
  0x8b   : > { %592 = vmatpush.msk.msra.mxu2 %vm285_vm0, %v336_v4 }
  0x8c   : > { %593 = vmatmul.msk.f32.vlgmr.msra.gmra.mxu2 %vm281_vm1, %v591_v5 }
  0x8d   : > { %599 = vmatpush.msk.msrb.mxu2 %vm285_vm0, %v336_v4 }
  0x92   : > { %v280_v7 = vpop.permute.xlu0 %279 }
  0x93   : > { %587 = vmatpush.msk.msra.mxu0 %vm285_vm0, %v280_v7 }
  0x94   : > { %588 = vmatmul.msk.f32.vlgmr.msra.gmra.mxu0 %vm281_vm1, %v586_v6  ;;  %600 = vmatmul.msk.f32.vlgmr.msrb.gmra.mxu2 %vm281_vm1, %v471_v8 }
  0x96   : > { %v330_v10 = vpop.f32.mrf.mxu1 }
  0x9a   : > { %v467_v31 = vpop.permute.xlu0 %466 }
 0x10f   : > { %v359_v12 = vpop.f32.mrf.mxu2 }
 0x111   : > { %v305_v11 = vpop.f32.mrf.mxu0 }
 0x112   : > { %v331_v13 = vadd.f32 %v330_v10, %v305_v11 }
 0x114   : > { %v362_v15 = vadd.f32 %v359_v12, %v331_v13 }
 0x116   : > { %v369_v16 = vadd.f32 %v367_v14, %v362_v15 }
 0x117   : > { %v498_v33 = vpop.f32.mrf.mxu2 }
 0x118   : > { %v370_v17 = vmax.f32 %v369_v16, 0.0 }
 0x11a   : > { %374 = vrot.lane.b32.xlu1 %v370_v17, %s719_s16 }
 0x122   : > { %475 = vperm.xlu1 %649, %v472_v18  }
 0x18c   : > { %v375_v19 = vpop.permute.xlu1 %374 }
 0x18d   : > { %378 = vst.msk [vmem:[#allocation2] sm:$0xff] %vm377_vm3, %v375_v19 }
 0x194   : > { %v379_v20 = vld [vmem:[#allocation2] sm:$0xff]  ;;  %v476_v34 = vpop.permute.xlu1 %475 }
 0x195   : > { %384 = vrot.lane.b32.xlu2 %v379_v20, %s716_s19  ;;  %429 = vmatpush.msrb.mxu0 %v379_v20  ;;  %v499_v36 = vadd.f32 %v498_v33, %v476_v34  ;;  %s671_s19 = scalar_lea.hbm %s894_s7, 16 }
 0x196   : > { %596 = vmatmul.msk.f32.vlgmr.msrb.gmra.mxu0 %vm387_vm4, %v380_v21  ;;  %p673_p1 = scmp.lt.s32.totalorder %s671_s19, %s667_s8 }
 0x198   : > { %p674_p2 = por %p673_p1, %p672_p0 }
 0x19a   : > { %p675_p3 = pnand %p674_p2, %p670_p13 }
 0x19d   : > { %436 = vrot.lane.b32.xlu2 %v379_v20, %s715_s18 }
 0x1ef   : > { %v385_v24 = vpop.permute.xlu2 %384 }
 0x1f0   : > { %406 = vmatpush.msra.mxu3 %v385_v24 }
 0x1f1   : > { %595 = vmatmul.msk.f32.vlgmr.msra.gmra.mxu3 %vm387_vm4, %v594_v23 }
 0x1f7   : > { %v437_v26 = vpop.permute.xlu2 %436 }
 0x1f8   : > { %457 = vmatpush.msrb.mxu1 %v437_v26 }
 0x1f9   : > { %598 = vmatmul.msk.f32.vlgmr.msrb.gmra.mxu1 %vm387_vm4, %v597_v25 }
 0x213   : > { %v431_v27 = vpop.f32.mrf.mxu0 }
 0x274   : > { %v408_v28 = vpop.f32.mrf.mxu3 }
 0x275   : > { %v432_v29 = vadd.f32 %v431_v27, %v408_v28 }
 0x276   : > { %v459_v30 = vpop.f32.mrf.mxu1 }
 0x277   : > { %v462_v32 = vadd.f32 %v459_v30, %v432_v29 }
 0x279   : > { %v469_v35 = vadd.f32 %v467_v31, %v462_v32 }
 0x27b   : > { %v470_v37 = vmax.f32 %v469_v35, 0.0 }
 0x27d   : > { %v501_v38 = vadd.f32 %v499_v36, %v470_v37 }
 0x27f   : > { %v502_v39 = vmax.f32 %v501_v38, 0.0 }
 0x281   : > { %504 = vst.msk [vmem:[%s269_s21] sm:$0xff] %vm503_vm5, %v502_v39 }
 0x282   : > { %678 = shalt.err (!%p675_p3)
}
 0x283   : > { %605 = dma.vmem_to_hbm [thread:$0]  (%p798_p5), %s519_s22, 128, %s521_s23, %s506_s28  }
 0x284 PF: > { %p611_p4 = scmp.ge.s32.totalorder %s713_s27, 2  ;;  %s532_s13 = sand.u32 1, %s701_s24  }
 0x285   : > { %s533_s16 = scalar_lea.sflag [#allocation4], %s532_s13 }
 0x286   : > { %p608_p7 = pnand %p611_p4, %p802_p6 }
 0x288   : > { %p609_p8 = pneg %p608_p7 }
 0x28a   : > { %696 = dma.done.wait (%p609_p8), %s533_s16, 128  }
 0x28b   : > { %698 = vsyncadd (%p609_p8), %s533_s16, 4294967168  ;;  %p17_p9 = scmp.ge.s32.totalorder %s785_s30, 4   ;;  %s897_s24 = smov %s705_s25 }
 0x28c   : > { %s898_s25 = smov %s709_s26  ;;  %s899_s26 = smov %s796_s10 }
 0x28d   : > { %s900_s27 = smov %s785_s30  ;;  %19 = sbr.rel (!%p17_p9) target bundleno = 3 (0x3), region = 87 }
 0x292   :  { %539 = vsyncpa [#allocation4], 1 }
 0x293   :  { %541 = vsyncpa [#allocation4 + $0x1], 1 }

</bundles_post_ra>
